<compile_context>
chip_gen: v6e
topology: v6e:2x2x1
jax: 0.10.0
libtpu: 0.0.40
codegen_flags: <defaults>
</compile_context>

<pallas_src>
import functools

import jax
import jax.numpy as jnp
from jax.experimental import pallas as pl
from jax.experimental.pallas import tpu as pltpu


# ---------------------------------------------------------------------------
# Kernels
# ---------------------------------------------------------------------------
def _upsample_fused_kernel(x_ref, u_ref, o_ref, *, precision):
    """x_ref: (rb, K); u_ref: (K, 4K) fused one-hot; o_ref: (rb, 4K).

    One matmul produces the full output row (both duplicated image rows and the
    lane interleave) -> a single full-width, unmasked store per block.
    """
    y = jnp.dot(x_ref[...], u_ref[...],
                preferred_element_type=jnp.float32,
                precision=precision)
    o_ref[...] = y.astype(o_ref.dtype)


def _upsample_chunked_kernel(x_ref, u_ref, o_ref, *, chunk, num_chunks, precision):
    """x_ref: (rb, W); u_ref: (chunk, 2*chunk) one-hot; o_ref: (rb, 4W).

    W = chunk * num_chunks.  Chunking keeps the MXU contraction dim <= 128 and
    the one-hot matrix tiny; each widened chunk is stored twice (output image
    rows 2h and 2h+1 live in the two halves of the 4W-wide output row).
    """
    w = chunk * num_chunks
    for c in range(num_chunks):                       # static unroll
        xc = x_ref[:, c * chunk:(c + 1) * chunk]
        y = jnp.dot(xc, u_ref[...],
                    preferred_element_type=jnp.float32,
                    precision=precision).astype(o_ref.dtype)
        lo = 2 * chunk * c
        o_ref[:, lo:lo + 2 * chunk] = y
        o_ref[:, 2 * w + lo:2 * w + lo + 2 * chunk] = y


# ---------------------------------------------------------------------------
# Tiling helpers (all trace-time Python on static shapes)
# ---------------------------------------------------------------------------
def _round_up(x, m):
    return -(-x // m) * m


def _sublane_quantum(itemsize):
    # 8 rows for 4-byte dtypes, 16 for bf16/fp16, 32 for 1-byte dtypes.
    return max(8, 32 // itemsize)


def _pick_row_group(H, W):
    """Group G input image rows per kernel row so the output row is >=128
    lanes (dense, unmasked stores).  G must divide H so a group never
    straddles two images."""
    if 4 * W >= 128:
        return 1
    g_target = -(-128 // (4 * W))                     # ceil(128 / 4W)
    for g in range(min(g_target, H), 0, -1):
        if H % g == 0:
            return g
    return 1


def _pick_rows_block(n_rows, out_row_bytes, itemsize, target_out_bytes=4 << 20):
    """Rows per block: ~4 MiB of output per block (amortizes the ~0.35us
    per-grid-step overhead), a multiple of the dtype sublane quantum, and at
    least ~8 grid steps when the problem is big enough (pipelining + v7x
    2-TensorCore sharding).  Grid uses cdiv; the ragged last block is masked."""
    q = _sublane_quantum(itemsize)
    if n_rows <= q:
        return n_rows
    rb = max(q, (target_out_bytes // max(out_row_bytes, 1)) // q * q)
    cap = _round_up(-(-n_rows // 8), q)               # keep >= ~8 steps
    rb = min(rb, cap)
    return max(rb, q)


def _chunk_size(W):
    """Largest divisor of W that is <= 128 (contraction dim of the chunked
    expansion matmul)."""
    best = 1
    for c in range(1, min(W, 128) + 1):
        if W % c == 0:
            best = c
    return best


# ---------------------------------------------------------------------------
# Wrapper
# ---------------------------------------------------------------------------
@functools.partial(jax.jit, static_argnames=("with_conv",))
def upsample(x, with_conv=False):
    """Forward of DDPMUnet.Upsample: nearest 2x upsample of an NCHW tensor."""
    # TODO(synk): with_conv=True in the PyTorch module applies a *freshly
    # constructed, untrained* nn.Conv2d inside forward() (random weights every
    # call); only the deterministic nearest-upsample path is implemented.
    del with_conv

    N, C, H, W = x.shape
    orig_dtype = x.dtype
    if not jnp.issubdtype(orig_dtype, jnp.floating):
        # TODO(synk): integer inputs are routed through an exact f32 one-hot
        # matmul; values beyond 24-bit magnitude would lose precision.
        x = x.astype(jnp.float32)
    dtype = x.dtype
    itemsize = jnp.dtype(dtype).itemsize
    precision = (jax.lax.Precision.HIGHEST if dtype == jnp.float32
                 else jax.lax.Precision.DEFAULT)

    # Path selection: fused (one matmul emits the whole 4K-wide output row)
    # while the contraction stays cheap enough to remain memory-bound even
    # under HIGHEST precision; otherwise chunk the expansion along W.
    G = _pick_row_group(H, W)
    K = G * W
    fused_k_max = 64 if precision == jax.lax.Precision.HIGHEST else 128
    use_fused = K <= fused_k_max
    chunk = num_chunks = None
    if not use_fused:
        chunk = _chunk_size(W)
        if chunk < 32:
            # TODO(synk): W has no divisor in [32, 128]; fall back to a single
            # full-width expansion matmul (O(W^2) MXU work, still correct).
            use_fused, G, K = True, 1, W
        else:
            num_chunks = W // chunk

    if use_fused:
        n_rows = N * C * H // G
        in_w = K
        out_w = 4 * K
        x2 = x.reshape(n_rows, in_w)                  # free reshape
        # U[k, j] = 1 iff input lane k = (g, w) feeds output lane
        # j = g*4W + a*2W + 2w + b, for a, b in {0, 1}  (row + column copy).
        k_idx = jnp.arange(K)
        j_idx = jnp.arange(out_w)
        u = ((j_idx[None, :] // (4 * W) == (k_idx // W)[:, None])
             & ((j_idx[None, :] % (2 * W)) // 2 == (k_idx % W)[:, None])
             ).astype(dtype)
        u_shape = (K, out_w)
        kernel = functools.partial(_upsample_fused_kernel, precision=precision)
        flops = 2 * n_rows * K * out_w
    else:
        n_rows = N * C * H
        in_w = W
        out_w = 4 * W
        x2 = x.reshape(n_rows, in_w)                  # free reshape
        # U[w, j] = 1 iff j // 2 == w  (W-interleave within one chunk).
        u = (jnp.arange(2 * chunk)[None, :] // 2
             == jnp.arange(chunk)[:, None]).astype(dtype)
        u_shape = (chunk, 2 * chunk)
        kernel = functools.partial(_upsample_chunked_kernel, chunk=chunk,
                                   num_chunks=num_chunks, precision=precision)
        flops = 2 * n_rows * W * 2 * chunk

    rb = _pick_rows_block(n_rows, out_w * itemsize, itemsize)
    grid = (pl.cdiv(n_rows, rb),)

    u_bytes = u_shape[0] * u_shape[1] * itemsize
    bytes_accessed = (n_rows * in_w + n_rows * out_w) * itemsize + u_bytes
    # double-buffered input + output blocks, resident one-hot U, plus slack
    vmem_need = 2 * rb * (in_w + out_w) * itemsize + 2 * u_bytes + (2 << 20)
    vmem_limit = int(min(max(vmem_need, 16 << 20), 48 << 20))

    out2 = pl.pallas_call(
        kernel,
        out_shape=jax.ShapeDtypeStruct((n_rows, out_w), dtype),
        grid=grid,
        in_specs=[
            pl.BlockSpec((rb, in_w), lambda i: (i, 0)),
            pl.BlockSpec(u_shape, lambda i: (0, 0)),   # constant, stays resident
        ],
        out_specs=pl.BlockSpec((rb, out_w), lambda i: (i, 0)),
        compiler_params=pltpu.CompilerParams(
            dimension_semantics=("parallel",),
            vmem_limit_bytes=vmem_limit),
        cost_estimate=pl.CostEstimate(
            flops=int(flops), transcendentals=0,
            bytes_accessed=int(bytes_accessed)),
    )(x2, u)

    # (n_rows, out_w) row-major is bit-identical to (N, C, 2H, 2W) row-major.
    out = out2.reshape(N, C, 2 * H, 2 * W)
    if out.dtype != orig_dtype:
        out = out.astype(orig_dtype)
    return out


def upsample_ref(x):
    return jnp.repeat(jnp.repeat(x, 2, axis=2), 2, axis=3)


if __name__ == "__main__":
    key = jax.random.PRNGKey(0)

    # Main check: f32, small W -> grouped fused path (lane-dense 128-wide rows).
    N, C, H, W = 2, 4, 16, 16
    x = jax.random.normal(key, (N, C, H, W), dtype=jnp.float32)
    y = jax.block_until_ready(upsample(x))
    y_ref = upsample_ref(x)
    assert y.shape == (N, C, 2 * H, 2 * W)
    assert jnp.allclose(y, y_ref, atol=1e-6, rtol=1e-6), "f32 fused path mismatch"

    # bf16 activations (fused path, DEFAULT precision is exact for one-hot).
    xb = jax.random.normal(jax.random.PRNGKey(1), (2, 3, 8, 32), dtype=jnp.bfloat16)
    yb = jax.block_until_ready(upsample(xb))
    assert bool(jnp.array_equal(yb, upsample_ref(xb))), "bf16 fused path mismatch"

    # Large-W chunked path (K = 128 per matmul).
    xc = jax.random.normal(jax.random.PRNGKey(2), (1, 2, 4, 256), dtype=jnp.float32)
    yc = jax.block_until_ready(upsample(xc))
    assert jnp.allclose(yc, upsample_ref(xc), atol=1e-6, rtol=1e-6), \
        "f32 chunked path mismatch"

    print("KERNEL_OK")
</pallas_src>

<mosaic_0001>
module attributes {stable_mosaic.version = 11 : i64} {
  func.func @_upsample_fused_kernel(%arg0: i32, %arg1: memref<8x32xf32, #tpu.memory_space<vmem>>, %arg2: memref<32x128xf32, #tpu.memory_space<vmem>>, %arg3: memref<8x128xf32, #tpu.memory_space<vmem>>) attributes {dimension_semantics = [#tpu.dimension_semantics<parallel>], iteration_bounds = array<i64: 8>, scalar_prefetch = 0 : i64, scratch_operands = 0 : i64, tpu.core_type = #tpu.core_type<tc>, window_params = [{transform_indices = @transform_0, window_bounds = array<i64: 8, 32>}, {pipeline_mode = #tpu.pipeline_mode<synchronous>, transform_indices = @transform_1, window_bounds = array<i64: 32, 128>}, {transform_indices = @transform_2, window_bounds = array<i64: 8, 128>}]} {
    %c0 = arith.constant 0 : index
    %c0_0 = arith.constant 0 : index
    %0 = vector.load %arg1[%c0, %c0_0] : memref<8x32xf32, #tpu.memory_space<vmem>>, vector<8x32xf32>
    %c0_1 = arith.constant 0 : index
    %c0_2 = arith.constant 0 : index
    %1 = vector.load %arg2[%c0_1, %c0_2] : memref<32x128xf32, #tpu.memory_space<vmem>>, vector<32x128xf32>
    %cst = arith.constant dense<0.000000e+00> : vector<8x128xf32>
    %2 = tpu.matmul %0, %1, %cst {dimension_numbers = #tpu.dot_dimension_numbers<[1], [0], [0], [1], [0, 0, 1, 1], [], []>, precision = #tpu.contract_precision<fp32>} : vector<8x32xf32>, vector<32x128xf32>, vector<8x128xf32> -> vector<8x128xf32>
    %c0_3 = arith.constant 0 : index
    %c0_4 = arith.constant 0 : index
    %3 = vector.load %arg3[%c0_3, %c0_4] : memref<8x128xf32, #tpu.memory_space<vmem>>, vector<8x128xf32>
    tpu.vector_store %arg3[%c0_3, %c0_4], %2 {strides = array<i32>} : memref<8x128xf32, #tpu.memory_space<vmem>>, vector<8x128xf32>,
    return
  }
  func.func @transform_0(%arg0: i32) -> (i32, i32) {
    %c0_i32 = arith.constant 0 : i32
    %c0_i32_0 = arith.constant 0 : i32
    return %arg0, %c0_i32 : i32, i32
  }
  func.func @transform_1(%arg0: i32) -> (i32, i32) {
    %c0_i32 = arith.constant 0 : i32
    %c0_i32_0 = arith.constant 0 : i32
    %c0_i32_1 = arith.constant 0 : i32
    return %c0_i32, %c0_i32_0 : i32, i32
  }
  func.func @transform_2(%arg0: i32) -> (i32, i32) {
    %c0_i32 = arith.constant 0 : i32
    %c0_i32_0 = arith.constant 0 : i32
    return %arg0, %c0_i32 : i32, i32
  }
}

</mosaic_0001>

<bundles_post_ra>
// kernel: upsample.1
= control target key start
LH: loop header
LB: loop body
LE: loop exit
PB: predicated region body
PF: predicated region fallthrough
CT: control target
= control target key end

     0   :  { %s827_s9 = smov 0   ;;  %s938_s0 = inlined_call_operand.vmem [shape: f32[64,32], index: 0, kind: input, shape index: {}]   ;;  %s939_s1 = inlined_call_operand.vmem [shape: f32[32,128], index: 1, kind: input, shape index: {}]   ;;  %s940_s2 = inlined_call_operand.vmem [shape: f32[64,128], index: 2, kind: output, shape index: {}]  }
   0x1 LB: > { %s687_s10 = sadd.s32 4294967295, %s808_s9   ;;  %p691_p0 = scmp.ge.s32.totalorder %s808_s9, 1  ;;  %s808_s9 = sphi %s827_s9, %s12_s9  }
   0x2   : > { %p111_p1 = scmp.lt.s32.totalorder %s808_s9, 9 }
   0x4   : > { %p112_p2 = pnand %p691_p0, %p111_p1 }
   0x5   : > { %p131_p3 = scmp.lt.s32.totalorder (!%p112_p2), %s687_s10, 7 }
   0x6   : > { %115 = sbr.rel (%p112_p2) target bundleno = 244 (0xf4), region = 28 }
   0xb   : > { %v143_v0 = vld [vmem:[%s939_s1 + $0x18] sm:$0xff]  ;;  %v142_v1 = vld [vmem:[%s939_s1 + $0x10] sm:$0xff]  ;;  %v141_v2 = vld [vmem:[%s939_s1 + $0x8] sm:$0xff]  ;;  %v810_v3 = vmov 0.0   ;;  %vm811_vm0 = vmmov 0   ;;  %s942_s10 = smov (!%p131_p3, %s687_s10), 7 }
   0xc   : > { %726 = vmatprep.subr.mxu0 %v810_v3  ;;  %v845_v4 = vand.u32 4294901760, %v143_v0  ;;  %737 = vmatprep.subr.mxu1 %v810_v3  ;;  %v848_v5 = vand.u32 4294901760, %v142_v1  ;;  %v850_v6 = vand.u32 4294901760, %v141_v2  ;;  %v140_v7 = vld [vmem:[%s939_s1] sm:$0xff]  ;;  %s692_s19 = sshll.u32 %s942_s10, 3  ;;  %vm144_vm1 = vcmask 261120  }
   0xd   : > { %v855_v8 = vand.u32 4294901760, %v140_v7  ;;  %734 = vmatprep.mubr.msk.f32.mxu0 %vm811_vm0, %v810_v3  ;;  %745 = vmatprep.mubr.msk.f32.mxu1 %vm811_vm0, %v810_v3  ;;  %s134_s22 = scalar_lea.vmem %s938_s0, %s692_s19  ;;  %s138_s25 = scalar_lea.vmem %s940_s2, %s692_s19 }
   0xe   : > { %727 = vmatpush3.msra.mxu0 %v845_v4  ;;  %v253_v9 = vsub.f32 %v143_v0, %v845_v4  ;;  %v866_v10 = vsub.f32 %v142_v1, %v848_v5  ;;  %v869_v11 = vsub.f32 %v141_v2, %v850_v6  ;;  %v139_v17 = vld [vmem:[%s134_s22] sm:$0xff] }
   0xf   : > { %728 = vmatprep.subr.mxu0 %v810_v3  ;;  %v873_v12 = vsub.f32 %v140_v7, %v855_v8  ;;  %v146_v21 = vsel %vm144_vm1, %v139_v17, 0 }
  0x10   : > { %v254_v13 = vand.u32 4294901760, %v253_v9  ;;  %729 = vmatpush3.msra.mxu0 %v848_v5  ;;  %v261_v14 = vand.u32 4294901760, %v866_v10  ;;  %v268_v15 = vand.u32 4294901760, %v869_v11  ;;  %v217_v22 = vand.u32 4294901760, %v146_v21 }
  0x11   : > { %730 = vmatprep.subr.mxu0 %v810_v3  ;;  %v275_v16 = vand.u32 4294901760, %v873_v12 }
  0x12   : > { %v255_v18 = vsub.f32 %v253_v9, %v254_v13  ;;  %v262_v19 = vsub.f32 %v866_v10, %v261_v14  ;;  %731 = vmatpush3.msra.mxu0 %v850_v6  ;;  %v269_v20 = vsub.f32 %v869_v11, %v268_v15  ;;  %v218_v26 = vsub.f32 %v146_v21, %v217_v22 }
  0x13   : > { %732 = vmatprep.subr.mxu0 %v810_v3  ;;  %v276_v25 = vsub.f32 %v873_v12, %v275_v16 }
  0x14   : > { %v256_v23 = vand.u32 4294901760, %v255_v18  ;;  %v263_v24 = vand.u32 4294901760, %v262_v19  ;;  %733 = vmatpush3.msra.mxu0 %v855_v8  ;;  %v270_v27 = vand.u32 4294901760, %v269_v20  ;;  %v219_v28 = vand.u32 4294901760, %v218_v26 }
  0x15   : > { %748 = vmatprep.subr.mxu0 %v810_v3  ;;  %v277_v29 = vand.u32 4294901760, %v276_v25 }
  0x16   : > { %738 = vmatpush3.msra.mxu1 %v256_v23  ;;  %v220_v30 = vsub.f32 %v218_v26, %v219_v28 }
  0x17   : > { %739 = vmatprep.subr.mxu1 %v810_v3 }
  0x18   : > { %740 = vmatpush3.msra.mxu1 %v263_v24  ;;  %v221_v31 = vand.u32 4294901760, %v220_v30 }
  0x19   : > { %741 = vmatprep.subr.mxu1 %v810_v3 }
  0x1a   : > { %742 = vmatpush3.msra.mxu1 %v270_v27  ;;  %735 = vmatmul.mubr.f32.vlgmr.msra.gmra.mxu0 %v221_v31 }
  0x1b   : > { %743 = vmatprep.subr.mxu1 %v810_v3  ;;  %749 = vmatpush3.msra.mxu0 %v253_v9 }
  0x1c   : > { %744 = vmatpush3.msra.mxu1 %v277_v29  ;;  %750 = vmatprep.subr.mxu0 %v810_v3 }
  0x1d   : > { %746 = vmatmul.mubr.f32.vlgmr.msra.gmra.mxu1 %v217_v22  ;;  %759 = vmatprep.subr.mxu1 %v810_v3 }
  0x1e   : > { %760 = vmatpush3.msra.mxu1 %v845_v4  ;;  %751 = vmatpush3.msra.mxu0 %v866_v10 }
  0x1f   : > { %761 = vmatprep.subr.mxu1 %v810_v3  ;;  %752 = vmatprep.subr.mxu0 %v810_v3 }
  0x20   : > { %762 = vmatpush3.msra.mxu1 %v848_v5  ;;  %753 = vmatpush3.msra.mxu0 %v869_v11 }
  0x21   : > { %763 = vmatprep.subr.mxu1 %v810_v3  ;;  %754 = vmatprep.subr.mxu0 %v810_v3 }
  0x22   : > { %764 = vmatpush3.msra.mxu1 %v850_v6  ;;  %755 = vmatpush3.msra.mxu0 %v873_v12 }
  0x23   : > { %756 = vmatprep.mubr.msk.f32.mxu0 %vm811_vm0, %v810_v3  ;;  %765 = vmatprep.subr.mxu1 %v810_v3 }
  0x24   : > { %757 = vmatmul.mubr.f32.vlgmr.msra.gmra.mxu0 %v218_v26  ;;  %766 = vmatpush3.msra.mxu1 %v855_v8 }
  0x25   : > { %767 = vmatprep.mubr.msk.f32.mxu1 %vm811_vm0, %v810_v3  ;;  %770 = vmatprep.subr.mxu0 %v810_v3 }
  0x26   : > { %768 = vmatmul.mubr.f32.vlgmr.msra.gmra.mxu1 %v219_v28  ;;  %771 = vmatpush3.msra.mxu0 %v254_v13 }
  0x27   : > { %781 = vmatprep.subr.mxu1 %v810_v3  ;;  %772 = vmatprep.subr.mxu0 %v810_v3 }
  0x28   : > { %782 = vmatpush3.msra.mxu1 %v845_v4  ;;  %773 = vmatpush3.msra.mxu0 %v261_v14 }
  0x29   : > { %783 = vmatprep.subr.mxu1 %v810_v3  ;;  %774 = vmatprep.subr.mxu0 %v810_v3 }
  0x2a   : > { %784 = vmatpush3.msra.mxu1 %v848_v5  ;;  %775 = vmatpush3.msra.mxu0 %v268_v15 }
  0x2b   : > { %785 = vmatprep.subr.mxu1 %v810_v3  ;;  %776 = vmatprep.subr.mxu0 %v810_v3 }
  0x2c   : > { %786 = vmatpush3.msra.mxu1 %v850_v6  ;;  %777 = vmatpush3.msra.mxu0 %v275_v16 }
  0x2d   : > { %778 = vmatprep.mubr.msk.f32.mxu0 %vm811_vm0, %v810_v3  ;;  %787 = vmatprep.subr.mxu1 %v810_v3 }
  0x2e   : > { %779 = vmatmul.mubr.f32.vlgmr.msra.gmra.mxu0 %v217_v22  ;;  %788 = vmatpush3.msra.mxu1 %v855_v8 }
  0x2f   : > { %789 = vmatprep.mubr.msk.f32.mxu1 %vm811_vm0, %v810_v3 }
  0x30   : > { %790 = vmatmul.mubr.f32.vlgmr.msra.gmra.mxu1 %v217_v22 }
  0xda   : > { %v223_v32 = vpop.f32.mrf.mxu0 }
  0xdc   : > { %v736_v34 = vpop.f32.mrf.mxu0 }
  0xdd   : > { %v314_v33 = vpop.f32.mrf.mxu1 }
  0xde   : > { %v315_v39 = vadd.f32 %v314_v33, %v223_v32 }
  0xdf   : > { %v747_v35 = vpop.f32.mrf.mxu1 }
  0xe4   : > { %v394_v36 = vpop.f32.mrf.mxu0 }
  0xe5   : > { %v395_v41 = vadd.f32 %v394_v36, %v315_v39 }
  0xe6   : > { %v471_v37 = vpop.f32.mrf.mxu1  ;;  %v758_v38 = vpop.f32.mrf.mxu0 }
  0xe7   : > { %v472_v42 = vadd.f32 %v471_v37, %v395_v41 }
  0xe8   : > { %v769_v40 = vpop.f32.mrf.mxu1 }
  0xee   : > { %v554_v43 = vpop.f32.mrf.mxu0 }
  0xef   : > { %v555_v44 = vadd.f32 %v554_v43, %v472_v42 }
  0xf0   : > { %v629_v45 = vpop.f32.mrf.mxu1  ;;  %v780_v46 = vpop.f32.mrf.mxu0 }
  0xf1   : > { %v630_v47 = vadd.f32 %v629_v45, %v555_v44 }
  0xf2   : > { %v791_v48 = vpop.f32.mrf.mxu1 }
  0xf3   : > { %633 = vst [vmem:[%s138_s25] sm:$0xff] %v630_v47 }
  0xf4 PF: > { %s12_s9 = sadd.s32 1, %s808_s9  }
  0xf5   : > { %p9_p4 = scmp.ge.s32.totalorder %s12_s9, 10  }
  0xf7   :  { %11 = sbr.rel (!%p9_p4) target bundleno = 1 (0x1), region = 58 }

</bundles_post_ra>
